<compile_context>
chip_gen: v7x
topology: tpu7x:2x2x1
jax: 0.10.0
libtpu: 0.0.40
codegen_flags: <defaults>
</compile_context>

<pallas_src>
import jax
import jax.numpy as jnp
from jax.experimental import pallas as pl
from jax.experimental.pallas import tpu as pltpu

NO_OBSERVATIONS = 4   # CartPole-v1 observation dim
NO_ACTIONS = 2        # CartPole-v1 action dim
HIDDEN = 128
OUT_PAD = 128         # lane-dense padded output width (>= NO_ACTIONS)


def dqn_kernel(x_ref, w1_ref, b1_ref, w2_ref, b2_ref, w3_ref, b3_ref, o_ref):
    x = x_ref[...].astype(jnp.float32)                       # [TB, 4]
    w1 = w1_ref[...].astype(jnp.float32)                     # [4, H]

    # Layer 1: contraction depth 4 -> VPU broadcast-multiply-add (skip the MXU).
    h1 = b1_ref[...].astype(jnp.float32) + x[:, 0:1] * w1[0:1, :]
    for k in range(1, NO_OBSERVATIONS):                      # unrolled at trace time
        h1 = h1 + x[:, k:k + 1] * w1[k:k + 1, :]
    h1 = jnp.maximum(h1, 0.0)                                # [TB, H]

    # Layer 2: 128x128 MXU matmul, f32 accumulation.
    h2 = jnp.dot(h1, w2_ref[...].astype(jnp.float32),
                 preferred_element_type=jnp.float32) + b2_ref[...].astype(jnp.float32)
    h2 = jnp.maximum(h2, 0.0)                                # [TB, H]

    # Layer 3: padded to OUT_PAD lanes -> unmasked, lane-dense store.
    out = jnp.dot(h2, w3_ref[...].astype(jnp.float32),
                  preferred_element_type=jnp.float32) + b3_ref[...].astype(jnp.float32)
    o_ref[...] = out.astype(o_ref.dtype)                     # [TB, OUT_PAD]


def dqn_forward(x, prepared_params, *, block_b=256):
    """x: [B, NO_OBSERVATIONS]; prepared_params from prepare_params()."""
    w1, b1, w2, b2, w3p, b3p = prepared_params
    B = x.shape[0]
    H = w2.shape[0]
    tb = min(block_b, B)
    grid = (pl.cdiv(B, tb),)

    flops = 2 * B * (NO_OBSERVATIONS * H + H * H + H * OUT_PAD)
    bytes_accessed = int(
        x.size * x.dtype.itemsize
        + sum(int(p.size) * p.dtype.itemsize for p in prepared_params)
        + B * OUT_PAD * 4
    )

    out_padded = pl.pallas_call(
        dqn_kernel,
        out_shape=jax.ShapeDtypeStruct((B, OUT_PAD), jnp.float32),
        grid=grid,
        in_specs=[
            pl.BlockSpec((tb, NO_OBSERVATIONS), lambda i: (i, 0)),   # x tile streams
            pl.BlockSpec((NO_OBSERVATIONS, H), lambda i: (0, 0)),    # w1 resident
            pl.BlockSpec((1, H), lambda i: (0, 0)),                  # b1 resident
            pl.BlockSpec((H, H), lambda i: (0, 0)),                  # w2 resident
            pl.BlockSpec((1, H), lambda i: (0, 0)),                  # b2 resident
            pl.BlockSpec((H, OUT_PAD), lambda i: (0, 0)),            # w3 (padded) resident
            pl.BlockSpec((1, OUT_PAD), lambda i: (0, 0)),            # b3 (padded) resident
        ],
        out_specs=pl.BlockSpec((tb, OUT_PAD), lambda i: (i, 0)),
        compiler_params=pltpu.CompilerParams(
            dimension_semantics=("parallel",)),                      # megacore on v7x
        cost_estimate=pl.CostEstimate(
            flops=flops, transcendentals=0, bytes_accessed=bytes_accessed),
    )(x, w1, b1, w2, b2, w3p, b3p)

    return out_padded[:, :NO_ACTIONS]


def init_params(key):
    """Deterministic init mirroring nn.Linear default (uniform +-1/sqrt(fan_in))."""
    def linear(key, fan_in, fan_out):
        kw, kb = jax.random.split(key)
        bound = 1.0 / jnp.sqrt(fan_in)
        w = jax.random.uniform(kw, (fan_in, fan_out), jnp.float32, -bound, bound)
        b = jax.random.uniform(kb, (1, fan_out), jnp.float32, -bound, bound)
        return w, b

    k1, k2, k3 = jax.random.split(key, 3)
    w1, b1 = linear(k1, NO_OBSERVATIONS, HIDDEN)
    w2, b2 = linear(k2, HIDDEN, HIDDEN)
    w3, b3 = linear(k3, HIDDEN, NO_ACTIONS)
    return (w1, b1, w2, b2, w3, b3)


def prepare_params(params, *, weight_dtype=jnp.float32):
    """Pad layer3 to OUT_PAD lanes and (optionally) cast weights to bf16."""
    w1, b1, w2, b2, w3, b3 = params
    w3p = jnp.zeros((w3.shape[0], OUT_PAD), jnp.float32).at[:, :w3.shape[1]].set(w3)
    b3p = jnp.zeros((1, OUT_PAD), jnp.float32).at[:, :b3.shape[1]].set(b3.reshape(1, -1))
    return (
        w1.astype(weight_dtype),
        b1.reshape(1, -1).astype(jnp.float32),
        w2.astype(weight_dtype),
        b2.reshape(1, -1).astype(jnp.float32),
        w3p.astype(weight_dtype),
        b3p,
    )


def dqn_ref(x, params):
    """Pure-JAX reference (matches the PyTorch forward); computes in f32."""
    w1, b1, w2, b2, w3, b3 = params
    f = lambda a: a.astype(jnp.float32)
    h = jnp.maximum(x @ f(w1) + f(b1), 0.0)
    h = jnp.maximum(h @ f(w2) + f(b2), 0.0)
    return h @ f(w3) + f(b3)


if __name__ == "__main__":
    key = jax.random.PRNGKey(0)
    kp, kx, kx2 = jax.random.split(key, 3)
    params = init_params(kp)

    # --- small batch (single tile) ---
    batch = 8
    x = jax.random.normal(kx, (batch, NO_OBSERVATIONS), jnp.float32)
    out = dqn_forward(x, prepare_params(params))
    jax.block_until_ready(out)
    ref = dqn_ref(x, params)
    assert out.shape == (batch, NO_ACTIONS)
    assert jnp.allclose(out, ref, atol=1e-4, rtol=1e-4)

    # --- multi-tile grid path (non-divisible edge tile) ---
    batch2 = 200
    x2 = jax.random.normal(kx2, (batch2, NO_OBSERVATIONS), jnp.float32)
    out2 = dqn_forward(x2, prepare_params(params), block_b=128)
    jax.block_until_ready(out2)
    ref2 = dqn_ref(x2, params)
    assert out2.shape == (batch2, NO_ACTIONS)
    assert jnp.allclose(out2, ref2, atol=1e-4, rtol=1e-4)

    # --- bf16 weights (halves w2 HBM traffic; accumulation stays f32) ---
    w1, b1, w2, b2, w3, b3 = params
    params_bf16 = (w1.astype(jnp.bfloat16), b1, w2.astype(jnp.bfloat16), b2,
                   w3.astype(jnp.bfloat16), b3)
    out_bf16 = dqn_forward(x, prepare_params(params, weight_dtype=jnp.bfloat16))
    jax.block_until_ready(out_bf16)
    ref_bf16 = dqn_ref(x, params_bf16)
    assert jnp.allclose(out_bf16, ref_bf16, atol=1e-3, rtol=1e-3)

    # TODO(synk): the surrounding RL machinery (gym env, replay buffer, optimizer,
    # epsilon-greedy action selection) is host-side training-loop code, not part of
    # the nn.Module forward, and is intentionally not translated to Pallas.
    print("KERNEL_OK")
</pallas_src>

<mosaic_0001>
module attributes {stable_mosaic.version = 11 : i64} {
  func.func @dqn_kernel(%arg0: i32, %arg1: memref<8x4xf32, #tpu.memory_space<vmem>>, %arg2: memref<4x128xf32, #tpu.memory_space<vmem>>, %arg3: memref<1x128xf32, #tpu.memory_space<vmem>>, %arg4: memref<128x128xf32, #tpu.memory_space<vmem>>, %arg5: memref<1x128xf32, #tpu.memory_space<vmem>>, %arg6: memref<128x128xf32, #tpu.memory_space<vmem>>, %arg7: memref<1x128xf32, #tpu.memory_space<vmem>>, %arg8: memref<8x128xf32, #tpu.memory_space<vmem>>) attributes {dimension_semantics = [#tpu.dimension_semantics<parallel>], iteration_bounds = array<i64: 1>, scalar_prefetch = 0 : i64, scratch_operands = 0 : i64, tpu.core_type = #tpu.core_type<tc>, window_params = [{transform_indices = @transform_0, window_bounds = array<i64: 8, 4>}, {pipeline_mode = #tpu.pipeline_mode<synchronous>, transform_indices = @transform_1, window_bounds = array<i64: 4, 128>}, {pipeline_mode = #tpu.pipeline_mode<synchronous>, transform_indices = @transform_2, window_bounds = array<i64: 1, 128>}, {pipeline_mode = #tpu.pipeline_mode<synchronous>, transform_indices = @transform_3, window_bounds = array<i64: 128, 128>}, {pipeline_mode = #tpu.pipeline_mode<synchronous>, transform_indices = @transform_4, window_bounds = array<i64: 1, 128>}, {pipeline_mode = #tpu.pipeline_mode<synchronous>, transform_indices = @transform_5, window_bounds = array<i64: 128, 128>}, {pipeline_mode = #tpu.pipeline_mode<synchronous>, transform_indices = @transform_6, window_bounds = array<i64: 1, 128>}, {transform_indices = @transform_7, window_bounds = array<i64: 8, 128>}]} {
    %c0 = arith.constant 0 : index
    %c0_0 = arith.constant 0 : index
    %0 = vector.load %arg1[%c0, %c0_0] : memref<8x4xf32, #tpu.memory_space<vmem>>, vector<8x4xf32>
    %c0_1 = arith.constant 0 : index
    %c0_2 = arith.constant 0 : index
    %1 = vector.load %arg2[%c0_1, %c0_2] : memref<4x128xf32, #tpu.memory_space<vmem>>, vector<4x128xf32>
    %c0_3 = arith.constant 0 : index
    %c0_4 = arith.constant 0 : index
    %2 = vector.load %arg3[%c0_3, %c0_4] : memref<1x128xf32, #tpu.memory_space<vmem>>, vector<1x128xf32>
    %3 = vector.extract_strided_slice %0 {offsets = [0, 0], sizes = [8, 1], strides = [1, 1]} : vector<8x4xf32> to vector<8x1xf32>
    %4 = vector.extract_strided_slice %1 {offsets = [0, 0], sizes = [1, 128], strides = [1, 1]} : vector<4x128xf32> to vector<1x128xf32>
    %5 = vector.broadcast %3 : vector<8x1xf32> to vector<8x128xf32>
    %6 = vector.broadcast %4 : vector<1x128xf32> to vector<8x128xf32>
    %7 = arith.mulf %5, %6 : vector<8x128xf32>
    %8 = vector.broadcast %2 : vector<1x128xf32> to vector<8x128xf32>
    %9 = arith.addf %8, %7 : vector<8x128xf32>
    %10 = vector.extract_strided_slice %0 {offsets = [0, 1], sizes = [8, 1], strides = [1, 1]} : vector<8x4xf32> to vector<8x1xf32>
    %11 = vector.extract_strided_slice %1 {offsets = [1, 0], sizes = [1, 128], strides = [1, 1]} : vector<4x128xf32> to vector<1x128xf32>
    %12 = vector.broadcast %10 : vector<8x1xf32> to vector<8x128xf32>
    %13 = vector.broadcast %11 : vector<1x128xf32> to vector<8x128xf32>
    %14 = arith.mulf %12, %13 : vector<8x128xf32>
    %15 = arith.addf %9, %14 : vector<8x128xf32>
    %16 = vector.extract_strided_slice %0 {offsets = [0, 2], sizes = [8, 1], strides = [1, 1]} : vector<8x4xf32> to vector<8x1xf32>
    %17 = vector.extract_strided_slice %1 {offsets = [2, 0], sizes = [1, 128], strides = [1, 1]} : vector<4x128xf32> to vector<1x128xf32>
    %18 = vector.broadcast %16 : vector<8x1xf32> to vector<8x128xf32>
    %19 = vector.broadcast %17 : vector<1x128xf32> to vector<8x128xf32>
    %20 = arith.mulf %18, %19 : vector<8x128xf32>
    %21 = arith.addf %15, %20 : vector<8x128xf32>
    %22 = vector.extract_strided_slice %0 {offsets = [0, 3], sizes = [8, 1], strides = [1, 1]} : vector<8x4xf32> to vector<8x1xf32>
    %23 = vector.extract_strided_slice %1 {offsets = [3, 0], sizes = [1, 128], strides = [1, 1]} : vector<4x128xf32> to vector<1x128xf32>
    %24 = vector.broadcast %22 : vector<8x1xf32> to vector<8x128xf32>
    %25 = vector.broadcast %23 : vector<1x128xf32> to vector<8x128xf32>
    %26 = arith.mulf %24, %25 : vector<8x128xf32>
    %27 = arith.addf %21, %26 : vector<8x128xf32>
    %cst = arith.constant 0.000000e+00 : f32
    %28 = vector.broadcast %cst : f32 to vector<8x128xf32>
    %29 = arith.maximumf %27, %28 : vector<8x128xf32>
    %c0_5 = arith.constant 0 : index
    %c0_6 = arith.constant 0 : index
    %30 = vector.load %arg4[%c0_5, %c0_6] : memref<128x128xf32, #tpu.memory_space<vmem>>, vector<128x128xf32>
    %cst_7 = arith.constant dense<0.000000e+00> : vector<8x128xf32>
    %31 = tpu.matmul %29, %30, %cst_7 {dimension_numbers = #tpu.dot_dimension_numbers<[1], [0], [0], [1], [0, 0, 1, 1], [], []>} : vector<8x128xf32>, vector<128x128xf32>, vector<8x128xf32> -> vector<8x128xf32>
    %c0_8 = arith.constant 0 : index
    %c0_9 = arith.constant 0 : index
    %32 = vector.load %arg5[%c0_8, %c0_9] : memref<1x128xf32, #tpu.memory_space<vmem>>, vector<1x128xf32>
    %33 = vector.broadcast %32 : vector<1x128xf32> to vector<8x128xf32>
    %34 = arith.addf %31, %33 : vector<8x128xf32>
    %cst_10 = arith.constant 0.000000e+00 : f32
    %35 = vector.broadcast %cst_10 : f32 to vector<8x128xf32>
    %36 = arith.maximumf %34, %35 : vector<8x128xf32>
    %c0_11 = arith.constant 0 : index
    %c0_12 = arith.constant 0 : index
    %37 = vector.load %arg6[%c0_11, %c0_12] : memref<128x128xf32, #tpu.memory_space<vmem>>, vector<128x128xf32>
    %cst_13 = arith.constant dense<0.000000e+00> : vector<8x128xf32>
    %38 = tpu.matmul %36, %37, %cst_13 {dimension_numbers = #tpu.dot_dimension_numbers<[1], [0], [0], [1], [0, 0, 1, 1], [], []>} : vector<8x128xf32>, vector<128x128xf32>, vector<8x128xf32> -> vector<8x128xf32>
    %c0_14 = arith.constant 0 : index
    %c0_15 = arith.constant 0 : index
    %39 = vector.load %arg7[%c0_14, %c0_15] : memref<1x128xf32, #tpu.memory_space<vmem>>, vector<1x128xf32>
    %40 = vector.broadcast %39 : vector<1x128xf32> to vector<8x128xf32>
    %41 = arith.addf %38, %40 : vector<8x128xf32>
    %c0_16 = arith.constant 0 : index
    %c0_17 = arith.constant 0 : index
    %42 = vector.load %arg8[%c0_16, %c0_17] : memref<8x128xf32, #tpu.memory_space<vmem>>, vector<8x128xf32>
    tpu.vector_store %arg8[%c0_16, %c0_17], %41 {strides = array<i32>} : memref<8x128xf32, #tpu.memory_space<vmem>>, vector<8x128xf32>,
    return
  }
  func.func @transform_0(%arg0: i32) -> (i32, i32) {
    %c0_i32 = arith.constant 0 : i32
    %c0_i32_0 = arith.constant 0 : i32
    return %arg0, %c0_i32 : i32, i32
  }
  func.func @transform_1(%arg0: i32) -> (i32, i32) {
    %c0_i32 = arith.constant 0 : i32
    %c0_i32_0 = arith.constant 0 : i32
    %c0_i32_1 = arith.constant 0 : i32
    return %c0_i32, %c0_i32_0 : i32, i32
  }
  func.func @transform_2(%arg0: i32) -> (i32, i32) {
    %c0_i32 = arith.constant 0 : i32
    %c0_i32_0 = arith.constant 0 : i32
    %c0_i32_1 = arith.constant 0 : i32
    return %c0_i32, %c0_i32_0 : i32, i32
  }
  func.func @transform_3(%arg0: i32) -> (i32, i32) {
    %c0_i32 = arith.constant 0 : i32
    %c0_i32_0 = arith.constant 0 : i32
    %c0_i32_1 = arith.constant 0 : i32
    return %c0_i32, %c0_i32_0 : i32, i32
  }
  func.func @transform_4(%arg0: i32) -> (i32, i32) {
    %c0_i32 = arith.constant 0 : i32
    %c0_i32_0 = arith.constant 0 : i32
    %c0_i32_1 = arith.constant 0 : i32
    return %c0_i32, %c0_i32_0 : i32, i32
  }
  func.func @transform_5(%arg0: i32) -> (i32, i32) {
    %c0_i32 = arith.constant 0 : i32
    %c0_i32_0 = arith.constant 0 : i32
    %c0_i32_1 = arith.constant 0 : i32
    return %c0_i32, %c0_i32_0 : i32, i32
  }
  func.func @transform_6(%arg0: i32) -> (i32, i32) {
    %c0_i32 = arith.constant 0 : i32
    %c0_i32_0 = arith.constant 0 : i32
    %c0_i32_1 = arith.constant 0 : i32
    return %c0_i32, %c0_i32_0 : i32, i32
  }
  func.func @transform_7(%arg0: i32) -> (i32, i32) {
    %c0_i32 = arith.constant 0 : i32
    %c0_i32_0 = arith.constant 0 : i32
    return %arg0, %c0_i32 : i32, i32
  }
}

</mosaic_0001>

<bundles_post_ra>
// kernel: tpu_custom_call.1
= control target key start
LH: loop header
LB: loop body
LE: loop exit
PB: predicated region body
PF: predicated region fallthrough
CT: control target
= control target key end

     0   :  { %12 = vsyncpa [#allocation3], 0  ;;  %s673_s0 = inlined_call_operand.vmem [shape: f32[8,4], index: 0, kind: input, shape index: {}]   ;;  %s674_s1 = inlined_call_operand.vmem [shape: f32[4,128], index: 1, kind: input, shape index: {}]   ;;  %s675_s2 = inlined_call_operand.vmem [shape: f32[1,128], index: 2, kind: input, shape index: {}]   ;;  %s676_s3 = inlined_call_operand.hbm [shape: f32[128,128], index: 3, kind: input, shape index: {}]   ;;  %s677_s4 = inlined_call_operand.vmem [shape: f32[1,128], index: 4, kind: input, shape index: {}]   ;;  %s678_s5 = inlined_call_operand.hbm [shape: f32[128,128], index: 5, kind: input, shape index: {}]   ;;  %s679_s6 = inlined_call_operand.vmem [shape: f32[1,128], index: 6, kind: input, shape index: {}]   ;;  %s680_s7 = inlined_call_operand.hbm [shape: f32[8,128], index: 7, kind: output, shape index: {}]  }
   0x1   :  { %13 = vsyncpa [#allocation6], 0 }
   0x2   :  { %14 = vsyncpa [#allocation4], 0  ;;  %s554_s24 = smov [#allocation2]   ;;  %s482_s28 = scalar_lea.hbm %s676_s3, 2048 }
   0x3   :  { %s26_s25 = sshll.u32 %s554_s24, 4  ;;  %p483_p0 = scmp.ne.s32.totalorder %s676_s3, %s482_s28  ;;  %s27_s25 = int_to_ptr.vmem [resolvable:$true] %s26_s25 }
   0x4   :  { %p486_p1 = scmp.lt.u32.totalorder %s482_s28, %s676_s3 }
   0x6   :  { %p488_p2 = pnand %p486_p1, %p483_p0 }
   0x8   :  { %491 = shalt.err (!%p488_p2)
}
   0x9   :  { %s492_s10 = scalar_lea.vmem %s27_s25, 2048  ;;  %p497_p4 = scmp.lt.s32.totalorder %s27_s25, %s27_s25 }
   0xa   :  { %p493_p3 = scmp.ne.s32.totalorder %s27_s25, %s492_s10  ;;  %p498_p5 = scmp.lt.s32.totalorder %s492_s10, %s492_s10 }
   0xc   :  { %p499_p6 = por %p498_p5, %p497_p4 }
   0xe   :  { %p500_p7 = pnand %p499_p6, %p493_p3 }
  0x10   :  { %503 = shalt.err (!%p500_p7)
}
  0x11   :  { %s555_s11 = smov 128   ;;  %s556_s12 = smov 8  }
  0x12   :  { %32 = dma.hbm_to_vmem [thread:$0]  %s676_s3, 2048, %s27_s25, [#allocation3], %s555_s11, %s555_s11, %s556_s12  }
  0x13   :  { %s557_s15 = smov [#allocation5]   ;;  %s504_s19 = scalar_lea.hbm %s678_s5, 2048 }
  0x14   :  { %s40_s16 = sshll.u32 %s557_s15, 4  ;;  %p505_p8 = scmp.ne.s32.totalorder %s678_s5, %s504_s19  ;;  %s41_s16 = int_to_ptr.vmem [resolvable:$true] %s40_s16 }
  0x15   :  { %p508_p9 = scmp.lt.u32.totalorder %s504_s19, %s678_s5 }
  0x17   :  { %p510_p10 = pnand %p508_p9, %p505_p8 }
  0x19   :  { %513 = shalt.err (!%p510_p10)
}
  0x1a   :  { %s514_s24 = scalar_lea.vmem %s41_s16, 2048  ;;  %p519_p12 = scmp.lt.s32.totalorder %s41_s16, %s41_s16 }
  0x1b   :  { %p515_p11 = scmp.ne.s32.totalorder %s41_s16, %s514_s24  ;;  %p520_p13 = scmp.lt.s32.totalorder %s514_s24, %s514_s24 }
  0x1d   :  { %p521_p0 = por %p520_p13, %p519_p12 }
  0x1f   :  { %p522_p1 = pnand %p521_p0, %p515_p11 }
  0x21   :  { %525 = shalt.err (!%p522_p1)
}
  0x22   :  { %46 = dma.hbm_to_vmem [thread:$0]  %s678_s5, 2048, %s41_s16, [#allocation6], %s555_s11, %s555_s11, %s556_s12  }
  0x23   :  { %548 = dma.done.wait [#allocation3], 2048  }
  0x24   :  { %549 = vsyncadd [#allocation3], 4294965248 }
  0x25   :  { %550 = dma.done.wait [#allocation6], 2048  }
  0x26   :  { %551 = vsyncadd [#allocation6], 4294965248  ;;  %v558_v0 = vmov 0   ;;  %v559_v1 = vmov 2   ;;  %v560_v2 = vmov 0.0|0.0   ;;  %v55_v3 = vld [vmem:[%s673_s0] sm:$0xff]  ;;  %v63_v52 = vlaneseq }
  0x27   :  { %477 = vset.pattern.permute.xlu0 %v558_v0  ;;  %479 = vset.pattern.permute.xlu1 %v559_v1  ;;  %v106_v4 = vld [vmem:[#allocation2] sm:$0xff]  ;;  %v107_v5 = vld [vmem:[#allocation2 + $0x8] sm:$0xff]  ;;  %v108_v7 = vld [vmem:[#allocation2 + $0x10] sm:$0xff]  ;;  %v561_v12 = vmov 1   ;;  %v562_v13 = vmov 3   ;;  %vm563_vm0 = vmmov 0  }
  0x28   :  { %417 = vmatprep.subr.bf16.mxu0 %v560_v2  ;;  %441 = vmatprep.subr.bf16.mxu1 %v560_v2  ;;  %v418_v6 = vpack.c.bf16 %v107_v5, %v106_v4  ;;  %v109_v8 = vld [vmem:[#allocation2 + $0x18] sm:$0xff]  ;;  %v110_v10 = vld [vmem:[#allocation2 + $0x20] sm:$0xff]  ;;  %v111_v11 = vld [vmem:[#allocation2 + $0x28] sm:$0xff]  ;;  %v564_v23 = vmov 0.0   ;;  %v64_v53 = vshrl.u32 %v63_v52, 7  ;;  %s565_s9 = smov [#allocation7]  }
  0x29   :  { %60 = vperm.xlu0 %477, %v55_v3   ;;  %86 = vperm.xlu1 %479, %v55_v3   ;;  %v421_v9 = vpack.c.bf16 %v109_v8, %v108_v7  ;;  %v424_v14 = vpack.c.bf16 %v111_v11, %v110_v10  ;;  %v112_v15 = vld [vmem:[#allocation2 + $0x30] sm:$0xff]  ;;  %v113_v16 = vld [vmem:[#allocation2 + $0x38] sm:$0xff]  ;;  %v114_v18 = vld [vmem:[#allocation2 + $0x40] sm:$0xff]  ;;  %s300_s10 = sshll.u32 %s565_s9, 4  ;;  %s301_s10 = int_to_ptr.vmem [resolvable:$true] %s300_s10 }
  0x2a   :  { %419 = vmatpush3.bf16.msra.mxu0 %v418_v6  ;;  %v427_v17 = vpack.c.bf16 %v113_v16, %v112_v15  ;;  %v115_v19 = vld [vmem:[#allocation2 + $0x48] sm:$0xff]  ;;  %v116_v21 = vld [vmem:[#allocation2 + $0x50] sm:$0xff]  ;;  %v117_v22 = vld [vmem:[#allocation2 + $0x58] sm:$0xff]  ;;  %379 = vmatprep.mubr.msk.f32.mxu0 %vm563_vm0, %v564_v23  ;;  %v65_v54 = vsub.s32 0, %v64_v53  ;;  %v81_v57 = vsub.s32 1, %v64_v53  ;;  %v91_v59 = vsub.s32 2, %v64_v53  ;;  %p531_p3 = scmp.lt.s32.totalorder %s301_s10, %s301_s10 }
  0x2b   :  { %420 = vmatprep.subr.bf16.mxu0 %v560_v2  ;;  %v430_v20 = vpack.c.bf16 %v115_v19, %v114_v18  ;;  %v200_v24 = vld [vmem:[#allocation5] sm:$0xff]  ;;  %v201_v25 = vld [vmem:[#allocation5 + $0x8] sm:$0xff]  ;;  %v202_v26 = vld [vmem:[#allocation5 + $0x10] sm:$0xff]  ;;  %414 = vmatprep.mubr.msk.f32.mxu1 %vm563_vm0, %v564_v23  ;;  %v433_v29 = vpack.c.bf16 %v117_v22, %v116_v21  ;;  %v101_v61 = vsub.s32 3, %v64_v53  ;;  %s526_s11 = scalar_lea.vmem %s301_s10, 128 }
  0x2c   :  { %v442_v27 = vpack.c.bf16 %v201_v25, %v200_v24  ;;  %v203_v28 = vld [vmem:[#allocation5 + $0x18] sm:$0xff]  ;;  %v118_v30 = vld [vmem:[#allocation2 + $0x60] sm:$0xff]  ;;  %v119_v32 = vld [vmem:[#allocation2 + $0x68] sm:$0xff]  ;;  %p527_p2 = scmp.ne.s32.totalorder %s301_s10, %s526_s11  ;;  %p532_p4 = scmp.lt.s32.totalorder %s526_s11, %s526_s11 }
  0x2d   :  { %478 = vset.pattern.permute.xlu0 %v561_v12  ;;  %480 = vset.pattern.permute.xlu1 %v562_v13  ;;  %v445_v31 = vpack.c.bf16 %v203_v28, %v202_v26  ;;  %v204_v33 = vld [vmem:[#allocation5 + $0x20] sm:$0xff]  ;;  %v205_v34 = vld [vmem:[#allocation5 + $0x28] sm:$0xff]  ;;  %v436_v35 = vpack.c.bf16 %v119_v32, %v118_v30  ;;  %v120_v36 = vld [vmem:[#allocation2 + $0x70] sm:$0xff] }
  0x2e   :  { %76 = vperm.xlu0 %478, %v55_v3   ;;  %96 = vperm.xlu1 %480, %v55_v3   ;;  %v448_v37 = vpack.c.bf16 %v205_v34, %v204_v33  ;;  %v121_v38 = vld [vmem:[#allocation2 + $0x78] sm:$0xff]  ;;  %v206_v39 = vld [vmem:[#allocation5 + $0x30] sm:$0xff]  ;;  %v208_v43 = vld [vmem:[#allocation5 + $0x40] sm:$0xff]  ;;  %p533_p5 = por %p532_p4, %p531_p3 }
  0x2f   :  { %422 = vmatpush3.bf16.msra.mxu0 %v421_v9  ;;  %443 = vmatpush3.bf16.msra.mxu1 %v442_v27  ;;  %v207_v40 = vld [vmem:[#allocation5 + $0x38] sm:$0xff]  ;;  %v439_v41 = vpack.c.bf16 %v121_v38, %v120_v36  ;;  %v209_v44 = vld [vmem:[#allocation5 + $0x48] sm:$0xff]  ;;  %v210_v46 = vld [vmem:[#allocation5 + $0x50] sm:$0xff] }
  0x30   :  { %423 = vmatprep.subr.bf16.mxu0 %v560_v2  ;;  %444 = vmatprep.subr.bf16.mxu1 %v560_v2  ;;  %v451_v42 = vpack.c.bf16 %v207_v40, %v206_v39  ;;  %v454_v45 = vpack.c.bf16 %v209_v44, %v208_v43  ;;  %v211_v47 = vld [vmem:[#allocation5 + $0x58] sm:$0xff]  ;;  %v212_v49 = vld [vmem:[#allocation5 + $0x60] sm:$0xff]  ;;  %v213_v50 = vld [vmem:[#allocation5 + $0x68] sm:$0xff]  ;;  %p534_p6 = pnand %p533_p5, %p527_p2 }
  0x31   :  { %v457_v48 = vpack.c.bf16 %v211_v47, %v210_v46  ;;  %v460_v51 = vpack.c.bf16 %v213_v50, %v212_v49  ;;  %v56_v55 = vld [vmem:[%s674_s1] sm:$0xf] }
  0x32   :  { %481 = vset.pattern.permute.xlu0 %v562_v13  ;;  %v66_v56 = vrot.slane %v56_v55, %v65_v54  ;;  %v82_v63 = vrot.slane %v56_v55, %v81_v57  ;;  %v310_v0 = vld [vmem:[%s675_s2] ss:$0 sm:$0xff]  ;;  %v92_v1 = vrot.slane %v56_v55, %v91_v59  ;;  %v214_v13 = vld [vmem:[#allocation5 + $0x70] sm:$0xff] }
  0x33   :  { %425 = vmatpush3.bf16.msra.mxu0 %v424_v14  ;;  %446 = vmatpush3.bf16.msra.mxu1 %v445_v31  ;;  %v215_v14 = vld [vmem:[#allocation5 + $0x78] sm:$0xff]  ;;  %v311_v16 = vld [vmem:[%s677_s4] ss:$0 sm:$0xff] }
  0x34   :  { %426 = vmatprep.subr.bf16.mxu0 %v560_v2  ;;  %447 = vmatprep.subr.bf16.mxu1 %v560_v2  ;;  %v463_v15 = vpack.c.bf16 %v215_v14, %v214_v13  ;;  %v312_v21 = vld [vmem:[%s679_s6] ss:$0 sm:$0xff] }
  0x37   :  { %428 = vmatpush3.bf16.msra.mxu0 %v427_v17  ;;  %449 = vmatpush3.bf16.msra.mxu1 %v448_v37 }
  0x38   :  { %429 = vmatprep.subr.bf16.mxu0 %v560_v2  ;;  %450 = vmatprep.subr.bf16.mxu1 %v560_v2 }
  0x3b   :  { %431 = vmatpush3.bf16.msra.mxu0 %v430_v20  ;;  %452 = vmatpush3.bf16.msra.mxu1 %v451_v42 }
  0x3c   :  { %432 = vmatprep.subr.bf16.mxu0 %v560_v2  ;;  %453 = vmatprep.subr.bf16.mxu1 %v560_v2 }
  0x3f   :  { %434 = vmatpush3.bf16.msra.mxu0 %v433_v29  ;;  %455 = vmatpush3.bf16.msra.mxu1 %v454_v45 }
  0x40   :  { %435 = vmatprep.subr.bf16.mxu0 %v560_v2  ;;  %456 = vmatprep.subr.bf16.mxu1 %v560_v2 }
  0x43   :  { %437 = vmatpush3.bf16.msra.mxu0 %v436_v35  ;;  %458 = vmatpush3.bf16.msra.mxu1 %v457_v48 }
  0x44   :  { %438 = vmatprep.subr.bf16.mxu0 %v560_v2  ;;  %459 = vmatprep.subr.bf16.mxu1 %v560_v2 }
  0x47   :  { %440 = vmatpush3.bf16.msra.mxu0 %v439_v41  ;;  %461 = vmatpush3.bf16.msra.mxu1 %v460_v51 }
  0x48   :  { %462 = vmatprep.subr.bf16.mxu1 %v560_v2  ;;  %v102_v2 = vrot.slane %v56_v55, %v101_v61 }
  0x4b   :  { %464 = vmatpush3.bf16.msra.mxu1 %v463_v15 }
  0xa8   :  { %v61_v58 = vpop.permute.xlu0 %60  ;;  %v87_v60 = vpop.permute.xlu1 %86 }
  0xa9   :  { %v67_v62 = vmul.f32 %v66_v56, %v61_v58  ;;  %v93_v7 = vmul.f32 %v92_v1, %v87_v60 }
  0xab   :  { %v74_v5 = vadd.f32 %v310_v0, %v67_v62 }
  0xad   :  { %v77_v3 = vpop.permute.xlu0 %76  ;;  %v97_v4 = vpop.permute.xlu1 %96 }
  0xae   :  { %v83_v6 = vmul.f32 %v82_v63, %v77_v3  ;;  %v103_v9 = vmul.f32 %v102_v2, %v97_v4 }
  0xb0   :  { %v84_v8 = vadd.f32 %v83_v6, %v74_v5 }
  0xb2   :  { %v94_v10 = vadd.f32 %v93_v7, %v84_v8 }
  0xb4   :  { %v104_v11 = vadd.f32 %v103_v9, %v94_v10 }
  0xb6   :  { %v105_v12 = vmax.f32 %v104_v11, 0.0 }
  0xb8   :  { %380 = vmatmul.mubr.f32.vlgmr.msra.gmra.mrb[0].mxu0 %v105_v12 }
 0x18b   :  { %v195_v17 = vpop.f32.mrb[0].mxu0 }
 0x18c   :  { %v196_v18 = vadd.f32 %v311_v16, %v195_v17  ;;  %v381_v19 = vpop.f32.mrb[1].mxu0 }
 0x18e   :  { %v199_v20 = vmax.f32 %v196_v18, 0.0 }
 0x190   :  { %415 = vmatmul.mubr.f32.vlgmr.msra.gmra.mrb[0].mxu1 %v199_v20 }
 0x263   :  { %v289_v22 = vpop.f32.mrb[0].mxu1 }
 0x264   :  { %v290_v23 = vadd.f32 %v312_v21, %v289_v22  ;;  %v416_v24 = vpop.f32.mrb[1].mxu1 }
 0x266   :  { %293 = vst [vmem:[#allocation7] sm:$0xff] %v290_v23 }
 0x267   :  { %537 = shalt.err (!%p534_p6)
}
 0x268   :  { %s538_s13 = scalar_lea.hbm %s680_s7, 128 }
 0x269   :  { %p539_p7 = scmp.ne.s32.totalorder %s680_s7, %s538_s13  ;;  %p542_p8 = scmp.lt.u32.totalorder %s538_s13, %s680_s7 }
 0x26b   :  { %p544_p9 = pnand %p542_p8, %p539_p7 }
 0x26d   :  { %547 = shalt.err (!%p544_p9)
}
 0x26e   :  { %303 = dma.vmem_to_hbm [thread:$0]  %s301_s10, 128, %s680_s7, [#allocation4]  }
 0x26f   :  { %552 = dma.done.wait [#allocation4], 128  }
 0x270   :  { %553 = vsyncadd [#allocation4], 4294967168 }
 0x271   :  { %307 = vsyncpa [#allocation3], 1 }
 0x272   :  { %308 = vsyncpa [#allocation6], 1 }
 0x273   :  { %309 = vsyncpa [#allocation4], 1 }

</bundles_post_ra>
